<compile_context>
chip_gen: v5e
topology: v5e:2x2
jax: 0.10.0
libtpu: 0.0.40
codegen_flags: <defaults>
</compile_context>

<pallas_src>
import functools

import jax
import jax.numpy as jnp
from jax.experimental import pallas as pl
from jax.experimental.pallas import tpu as pltpu


def _round_up(x: int, m: int) -> int:
    return ((x + m - 1) // m) * m


def _softplus(x):
    # numerically-stable softplus == jax.nn.softplus (elementwise, VPU/EUP)
    return jnp.maximum(x, 0.0) + jnp.log1p(jnp.exp(-jnp.abs(x)))


def _lnn_dx(h, u, w_h, w_u, bias, lambda_res):
    """Shared dx_dt math on one (TB, Hp) tile. h/u f32, weights f32 or bf16."""
    Hp = h.shape[-1]
    wdt = w_h.dtype
    # Two accumulated K=Hp MXU dots instead of one K=2Hp dot on a lane-concat.
    fused = jnp.dot(h.astype(wdt), w_h, preferred_element_type=jnp.float32)
    fused = fused + jnp.dot(u.astype(wdt), w_u, preferred_element_type=jnp.float32)
    fused = fused + bias                       # (1, 2Hp) broadcast over batch

    activation_input = fused[:, :Hp]           # h@W^T + u@U^T + b
    tau_control = fused[:, Hp:]                # Linear_h(h) + Linear_u(u) + tau_b

    tau_positive = _softplus(tau_control) + 0.01
    # EUP approx reciprocal + one Newton-Raphson refinement on the VALU.
    inv_tau = pl.reciprocal(tau_positive, approx=True)
    inv_tau = inv_tau * (2.0 - tau_positive * inv_tau)
    dx_dt = -h * inv_tau + jnp.tanh(activation_input)
    if lambda_res > 0.0:
        dx_dt = dx_dt + lambda_res * u
    return jnp.clip(dx_dt, -10.0, 10.0)


# ----------------------------- kernels ------------------------------------


def lnn_cell_kernel(h_ref, u_ref, w_h_ref, w_u_ref, bias_ref, out_ref,
                    *, lambda_res: float):
    out_ref[...] = _lnn_dx(h_ref[...], u_ref[...], w_h_ref[...], w_u_ref[...],
                           bias_ref[...], lambda_res)


def lnn_scan_kernel(h0_ref, u_ref, w_h_ref, w_u_ref, bias_ref, hout_ref,
                    h_carry, *, lambda_res: float, dt: float):
    """Grid = (batch_tiles ["parallel"], T ["arbitrary"]); weights stay
    VMEM-resident across all T steps; h is carried in VMEM scratch."""
    t = pl.program_id(1)

    @pl.when(t == 0)
    def _():
        h_carry[...] = h0_ref[...]

    h = h_carry[...]
    dx_dt = _lnn_dx(h, u_ref[...], w_h_ref[...], w_u_ref[...],
                    bias_ref[...], lambda_res)
    h_new = h + dt * dx_dt
    h_carry[...] = h_new
    hout_ref[...] = h_new


# --------------------------- host wrappers ---------------------------------


def prepare_lnn_params(params, *, compute_dtype=jnp.bfloat16):
    """One-time weight fusion (hoisted out of the hot path).

    Returns:
      w_h: (Hp, 2Hp) = [ W^T | tau_w_h_w^T ]
      w_u: (Hp, 2Hp) = [ U^T | tau_w_u_w^T ]
      b_fused: (1, 2Hp) f32 = [ b | tau_w_h_b + tau_w_u_b + tau_b ]
    Hp = H rounded up to a multiple of 128 (lane-aligned slices / stores).
    compute_dtype=bf16 (default) halves weight VMEM/HBM traffic and runs the
    MXU at native bf16 rate; pass jnp.float32 for exactness.
    """
    H = params["W"].shape[0]
    Hp = _round_up(H, 128)
    padw = lambda w: jnp.pad(w, ((0, Hp - H), (0, Hp - H)))
    padb = lambda b: jnp.pad(b, (0, Hp - H))

    w_h = jnp.concatenate([padw(params["W"]).T, padw(params["tau_w_h_w"]).T],
                          axis=1).astype(compute_dtype)
    w_u = jnp.concatenate([padw(params["U"]).T, padw(params["tau_w_u_w"]).T],
                          axis=1).astype(compute_dtype)
    tau_bias = params["tau_w_h_b"] + params["tau_w_u_b"] + params["tau_b"]
    b_fused = jnp.concatenate([padb(params["b"]), padb(tau_bias)])
    return w_h, w_u, b_fused.reshape(1, 2 * Hp).astype(jnp.float32)


_MAX_TILE_B = 256  # fills the 256-row MXU; keeps blocks well under scoped VMEM


def _tiling(B: int, tile_b):
    Bp = _round_up(B, 8)
    if tile_b is None:
        tile_b = min(Bp, _MAX_TILE_B)
    tile_b = _round_up(tile_b, 8)
    Bp = _round_up(Bp, tile_b)
    return Bp, tile_b


def _vmem_limit_bytes(w_h, w_u, b_fused, tile_b, Hp, n_blocked):
    wbytes = (w_h.size * w_h.dtype.itemsize + w_u.size * w_u.dtype.itemsize
              + b_fused.size * 4)
    blk = n_blocked * 2 * tile_b * Hp * 4          # double-buffered f32 blocks
    tmp = 8 * tile_b * Hp * 4                      # (TB,2Hp) fused + ew temps
    return int(max(wbytes + blk + tmp + (4 << 20), 32 << 20))


def lnn_cell_forward(h, u, w_h, w_u, b_fused, *, lambda_res=0.0, tile_b=None):
    """Single LNNCell.forward step. h, u: (B, H) f32 -> dx_dt (B, H) f32."""
    B, H = h.shape
    Hp = w_h.shape[0]
    assert w_h.shape == (Hp, 2 * Hp) and w_u.shape == (Hp, 2 * Hp)
    assert b_fused.shape == (1, 2 * Hp)

    Bp, tile_b = _tiling(B, tile_b)
    if (Bp, Hp) != (B, H):
        h = jnp.pad(h, ((0, Bp - B), (0, Hp - H)))
        u = jnp.pad(u, ((0, Bp - B), (0, Hp - H)))

    kernel = functools.partial(lnn_cell_kernel, lambda_res=float(lambda_res))
    resident = pl.BlockSpec(memory_space=pltpu.MemorySpace.VMEM)
    bh = pl.BlockSpec((tile_b, Hp), lambda i: (i, 0))

    out = pl.pallas_call(
        kernel,
        out_shape=jax.ShapeDtypeStruct((Bp, Hp), jnp.float32),
        grid_spec=pltpu.PrefetchScalarGridSpec(
            num_scalar_prefetch=0,
            grid=(Bp // tile_b,),
            in_specs=[bh, bh, resident, resident, resident],
            out_specs=bh),
        compiler_params=pltpu.CompilerParams(
            dimension_semantics=("parallel",),
            vmem_limit_bytes=_vmem_limit_bytes(w_h, w_u, b_fused, tile_b, Hp, 3)),
    )(h, u, w_h, w_u, b_fused)
    return out[:B, :H]


def lnn_scan_forward(h0, u_seq, w_h, w_u, b_fused, *, dt, lambda_res=0.0,
                     tile_b=None):
    """T Euler steps h <- h + dt*LNNCell(h, u_t) in ONE pallas_call.

    h0: (B, H), u_seq: (T, B, H). Returns all states (T, B, H).
    Weights are fetched from HBM once and stay VMEM-resident for all T steps.
    """
    T, B, H = u_seq.shape
    Hp = w_h.shape[0]
    assert h0.shape == (B, H)

    Bp, tile_b = _tiling(B, tile_b)
    if (Bp, Hp) != (B, H):
        h0 = jnp.pad(h0, ((0, Bp - B), (0, Hp - H)))
        u_seq = jnp.pad(u_seq, ((0, 0), (0, Bp - B), (0, Hp - H)))

    kernel = functools.partial(lnn_scan_kernel, lambda_res=float(lambda_res),
                               dt=float(dt))
    resident = pl.BlockSpec(memory_space=pltpu.MemorySpace.VMEM)

    hs = pl.pallas_call(
        kernel,
        out_shape=jax.ShapeDtypeStruct((T, Bp, Hp), jnp.float32),
        grid_spec=pltpu.PrefetchScalarGridSpec(
            num_scalar_prefetch=0,
            grid=(Bp // tile_b, T),
            in_specs=[
                pl.BlockSpec((tile_b, Hp), lambda bi, t: (bi, 0)),        # h0
                pl.BlockSpec((None, tile_b, Hp), lambda bi, t: (t, bi, 0)),  # u_t
                resident, resident, resident],
            out_specs=pl.BlockSpec((None, tile_b, Hp), lambda bi, t: (t, bi, 0)),
            scratch_shapes=[pltpu.VMEM((tile_b, Hp), jnp.float32)]),
        compiler_params=pltpu.CompilerParams(
            dimension_semantics=("parallel", "arbitrary"),
            vmem_limit_bytes=_vmem_limit_bytes(w_h, w_u, b_fused, tile_b, Hp, 3)),
    )(h0, u_seq, w_h, w_u, b_fused)
    return hs[:, :B, :H]


# --------------------------- reference / init -------------------------------


def init_params(key, hidden_size):
    """Deterministic synthetic init mirroring LNNCell.__init__ shapes."""
    ks = jax.random.split(key, 7)
    a = jax.random.normal(ks[0], (hidden_size, hidden_size), jnp.float32)
    q, _ = jnp.linalg.qr(a)
    W = q.astype(jnp.float32)                                   # orthogonal
    limit = (6.0 / (2 * hidden_size)) ** 0.5                    # xavier uniform
    U = jax.random.uniform(ks[1], (hidden_size, hidden_size), jnp.float32,
                           -limit, limit)
    b = jnp.zeros((hidden_size,), jnp.float32)
    lin_lim = 1.0 / (hidden_size ** 0.5)                        # nn.Linear-ish
    tau_w_h_w = jax.random.uniform(ks[2], (hidden_size, hidden_size),
                                   jnp.float32, -lin_lim, lin_lim)
    tau_w_h_b = jax.random.uniform(ks[3], (hidden_size,), jnp.float32,
                                   -lin_lim, lin_lim)
    tau_w_u_w = jax.random.uniform(ks[4], (hidden_size, hidden_size),
                                   jnp.float32, -lin_lim, lin_lim)
    tau_w_u_b = jax.random.uniform(ks[5], (hidden_size,), jnp.float32,
                                   -lin_lim, lin_lim)
    tau_b = jax.random.uniform(ks[6], (hidden_size,), jnp.float32, -2.0, 2.0)
    return dict(W=W, U=U, b=b,
                tau_w_h_w=tau_w_h_w, tau_w_h_b=tau_w_h_b,
                tau_w_u_w=tau_w_u_w, tau_w_u_b=tau_w_u_b, tau_b=tau_b)


def lnn_cell_ref(h, u, p, lambda_res=0.0):
    """Pure-JAX reference matching the PyTorch forward exactly."""
    tau_control = (h @ p["tau_w_h_w"].T + p["tau_w_h_b"]
                   + u @ p["tau_w_u_w"].T + p["tau_w_u_b"] + p["tau_b"])
    tau_positive = jax.nn.softplus(tau_control) + 0.01
    decay_term = -h / tau_positive
    activation_input = h @ p["W"].T + u @ p["U"].T + p["b"]
    dx_dt = decay_term + jnp.tanh(activation_input)
    if lambda_res > 0.0:
        dx_dt = dx_dt + lambda_res * u
    return jnp.clip(dx_dt, -10.0, 10.0)


def lnn_scan_ref(h0, u_seq, p, dt, lambda_res=0.0):
    def step(h, u):
        h_new = h + dt * lnn_cell_ref(h, u, p, lambda_res)
        return h_new, h_new
    _, hs = jax.lax.scan(step, h0, u_seq)
    return hs


if __name__ == "__main__":
    HIDDEN, BATCH, SEQ = 128, 8, 8

    key = jax.random.PRNGKey(0)
    kp, kh, ku, ks = jax.random.split(key, 4)
    params = init_params(kp, HIDDEN)
    h = jax.random.normal(kh, (BATCH, HIDDEN), jnp.float32)
    u = jax.random.normal(ku, (BATCH, HIDDEN), jnp.float32)

    # --- single step, exact f32 weight path ---------------------------------
    w_h32, w_u32, b32 = prepare_lnn_params(params, compute_dtype=jnp.float32)
    fwd = jax.jit(functools.partial(lnn_cell_forward, lambda_res=0.0))
    out32 = jax.block_until_ready(fwd(h, u, w_h32, w_u32, b32))
    ref = lnn_cell_ref(h, u, params, lambda_res=0.0)
    assert out32.shape == (BATCH, HIDDEN)
    assert jnp.allclose(out32, ref, atol=1e-4, rtol=1e-4), (
        float(jnp.max(jnp.abs(out32 - ref))))

    # --- single step, default bf16 weight path (perf mode, loose check) -----
    w_hb, w_ub, bb = prepare_lnn_params(params)          # bf16 by default
    outb = jax.block_until_ready(fwd(h, u, w_hb, w_ub, bb))
    assert jnp.all(jnp.isfinite(outb))
    assert jnp.allclose(outb, ref, atol=0.25, rtol=0.05), (
        float(jnp.max(jnp.abs(outb - ref))))

    # --- time-folded recurrence: weights fetched once for all T steps -------
    u_seq = jax.random.normal(ks, (SEQ, BATCH, HIDDEN), jnp.float32)
    DT = 0.02
    scan_fn = jax.jit(functools.partial(lnn_scan_forward, dt=DT, lambda_res=0.0))
    hs = jax.block_until_ready(scan_fn(h, u_seq, w_h32, w_u32, b32))
    hs_ref = lnn_scan_ref(h, u_seq, params, DT, lambda_res=0.0)
    assert hs.shape == (SEQ, BATCH, HIDDEN)
    assert jnp.allclose(hs, hs_ref, atol=1e-3, rtol=1e-3), (
        float(jnp.max(jnp.abs(hs - hs_ref))))

    print("KERNEL_OK")
</pallas_src>

<mosaic_0001>
module attributes {stable_mosaic.version = 11 : i64} {
  func.func @lnn_cell_kernel(%arg0: i32, %arg1: memref<8x128xf32, #tpu.memory_space<vmem>>, %arg2: memref<8x128xf32, #tpu.memory_space<vmem>>, %arg3: memref<128x256xf32, #tpu.memory_space<vmem>>, %arg4: memref<128x256xf32, #tpu.memory_space<vmem>>, %arg5: memref<1x256xf32, #tpu.memory_space<vmem>>, %arg6: memref<8x128xf32, #tpu.memory_space<vmem>>) attributes {dimension_semantics = [#tpu.dimension_semantics<parallel>], iteration_bounds = array<i64: 1>, scalar_prefetch = 0 : i64, scratch_operands = 0 : i64, tpu.core_type = #tpu.core_type<tc>, window_params = [{transform_indices = @transform_0, window_bounds = array<i64: 8, 128>}, {transform_indices = @transform_1, window_bounds = array<i64: 8, 128>}, {pipeline_mode = #tpu.pipeline_mode<synchronous>, transform_indices = @transform_2, window_bounds = array<i64: 128, 256>}, {pipeline_mode = #tpu.pipeline_mode<synchronous>, transform_indices = @transform_3, window_bounds = array<i64: 128, 256>}, {pipeline_mode = #tpu.pipeline_mode<synchronous>, transform_indices = @transform_4, window_bounds = array<i64: 1, 256>}, {transform_indices = @transform_5, window_bounds = array<i64: 8, 128>}]} {
    %c0 = arith.constant 0 : index
    %c0_0 = arith.constant 0 : index
    %0 = vector.load %arg1[%c0, %c0_0] : memref<8x128xf32, #tpu.memory_space<vmem>>, vector<8x128xf32>
    %c0_1 = arith.constant 0 : index
    %c0_2 = arith.constant 0 : index
    %1 = vector.load %arg2[%c0_1, %c0_2] : memref<8x128xf32, #tpu.memory_space<vmem>>, vector<8x128xf32>
    %c0_3 = arith.constant 0 : index
    %c0_4 = arith.constant 0 : index
    %2 = vector.load %arg3[%c0_3, %c0_4] : memref<128x256xf32, #tpu.memory_space<vmem>>, vector<128x256xf32>
    %c0_5 = arith.constant 0 : index
    %c0_6 = arith.constant 0 : index
    %3 = vector.load %arg4[%c0_5, %c0_6] : memref<128x256xf32, #tpu.memory_space<vmem>>, vector<128x256xf32>
    %c0_7 = arith.constant 0 : index
    %c0_8 = arith.constant 0 : index
    %4 = vector.load %arg5[%c0_7, %c0_8] : memref<1x256xf32, #tpu.memory_space<vmem>>, vector<1x256xf32>
    %cst = arith.constant dense<0.000000e+00> : vector<8x256xf32>
    %5 = tpu.matmul %0, %2, %cst {dimension_numbers = #tpu.dot_dimension_numbers<[1], [0], [0], [1], [0, 0, 1, 1], [], []>} : vector<8x128xf32>, vector<128x256xf32>, vector<8x256xf32> -> vector<8x256xf32>
    %cst_9 = arith.constant dense<0.000000e+00> : vector<8x256xf32>
    %6 = tpu.matmul %1, %3, %cst_9 {dimension_numbers = #tpu.dot_dimension_numbers<[1], [0], [0], [1], [0, 0, 1, 1], [], []>} : vector<8x128xf32>, vector<128x256xf32>, vector<8x256xf32> -> vector<8x256xf32>
    %7 = arith.addf %5, %6 : vector<8x256xf32>
    %8 = vector.broadcast %4 : vector<1x256xf32> to vector<8x256xf32>
    %9 = arith.addf %7, %8 : vector<8x256xf32>
    %10 = vector.extract_strided_slice %9 {offsets = [0, 0], sizes = [8, 128], strides = [1, 1]} : vector<8x256xf32> to vector<8x128xf32>
    %11 = vector.extract_strided_slice %9 {offsets = [0, 128], sizes = [8, 128], strides = [1, 1]} : vector<8x256xf32> to vector<8x128xf32>
    %cst_10 = arith.constant 0.000000e+00 : f32
    %12 = vector.broadcast %cst_10 : f32 to vector<8x128xf32>
    %13 = arith.maximumf %11, %12 : vector<8x128xf32>
    %14 = math.absf %11 : vector<8x128xf32>
    %cst_11 = arith.constant 0.000000e+00 : f32
    %15 = vector.broadcast %cst_11 : f32 to vector<8x128xf32>
    %16 = arith.subf %15, %14 : vector<8x128xf32>
    %17 = math.exp %16 : vector<8x128xf32>
    %18 = math.log1p %17 : vector<8x128xf32>
    %19 = arith.addf %13, %18 : vector<8x128xf32>
    %cst_12 = arith.constant 0.00999999977 : f32
    %20 = vector.broadcast %cst_12 : f32 to vector<8x128xf32>
    %21 = arith.addf %19, %20 : vector<8x128xf32>
    %22 = tpu.reciprocal %21 {approx = true} : vector<8x128xf32> -> vector<8x128xf32>
    %23 = arith.mulf %21, %22 : vector<8x128xf32>
    %cst_13 = arith.constant 2.000000e+00 : f32
    %24 = vector.broadcast %cst_13 : f32 to vector<8x128xf32>
    %25 = arith.subf %24, %23 : vector<8x128xf32>
    %26 = arith.mulf %22, %25 : vector<8x128xf32>
    %cst_14 = arith.constant 0.000000e+00 : f32
    %27 = vector.broadcast %cst_14 : f32 to vector<8x128xf32>
    %28 = arith.subf %27, %0 : vector<8x128xf32>
    %29 = arith.mulf %28, %26 : vector<8x128xf32>
    %30 = math.tanh %10 : vector<8x128xf32>
    %31 = arith.addf %29, %30 : vector<8x128xf32>
    %cst_15 = arith.constant -1.000000e+01 : f32
    %cst_16 = arith.constant 1.000000e+01 : f32
    %32 = vector.broadcast %cst_15 : f32 to vector<8x128xf32>
    %33 = arith.maximumf %32, %31 : vector<8x128xf32>
    %34 = vector.broadcast %cst_16 : f32 to vector<8x128xf32>
    %35 = arith.minimumf %34, %33 : vector<8x128xf32>
    %c0_17 = arith.constant 0 : index
    %c0_18 = arith.constant 0 : index
    %36 = vector.load %arg6[%c0_17, %c0_18] : memref<8x128xf32, #tpu.memory_space<vmem>>, vector<8x128xf32>
    tpu.vector_store %arg6[%c0_17, %c0_18], %35 {strides = array<i32>} : memref<8x128xf32, #tpu.memory_space<vmem>>, vector<8x128xf32>,
    return
  }
  func.func @transform_0(%arg0: i32) -> (i32, i32) {
    %c0_i32 = arith.constant 0 : i32
    %c0_i32_0 = arith.constant 0 : i32
    return %arg0, %c0_i32 : i32, i32
  }
  func.func @transform_1(%arg0: i32) -> (i32, i32) {
    %c0_i32 = arith.constant 0 : i32
    %c0_i32_0 = arith.constant 0 : i32
    return %arg0, %c0_i32 : i32, i32
  }
  func.func @transform_2(%arg0: i32) -> (i32, i32) {
    %c0_i32 = arith.constant 0 : i32
    %c0_i32_0 = arith.constant 0 : i32
    %c0_i32_1 = arith.constant 0 : i32
    return %c0_i32, %c0_i32_0 : i32, i32
  }
  func.func @transform_3(%arg0: i32) -> (i32, i32) {
    %c0_i32 = arith.constant 0 : i32
    %c0_i32_0 = arith.constant 0 : i32
    %c0_i32_1 = arith.constant 0 : i32
    return %c0_i32, %c0_i32_0 : i32, i32
  }
  func.func @transform_4(%arg0: i32) -> (i32, i32) {
    %c0_i32 = arith.constant 0 : i32
    %c0_i32_0 = arith.constant 0 : i32
    %c0_i32_1 = arith.constant 0 : i32
    return %c0_i32, %c0_i32_0 : i32, i32
  }
  func.func @transform_5(%arg0: i32) -> (i32, i32) {
    %c0_i32 = arith.constant 0 : i32
    %c0_i32_0 = arith.constant 0 : i32
    return %arg0, %c0_i32 : i32, i32
  }
}

</mosaic_0001>

<bundles_post_ra>
// kernel: lnn_cell_forward.1
= control target key start
LH: loop header
LB: loop body
LE: loop exit
PB: predicated region body
PF: predicated region fallthrough
CT: control target
= control target key end

     0   :  { %10 = vsyncpa [#allocation3], 0  ;;  %s484_s0 = inlined_call_operand.hbm [shape: f32[8,128], index: 0, kind: input, shape index: {}]   ;;  %s485_s1 = inlined_call_operand.hbm [shape: f32[8,128], index: 1, kind: input, shape index: {}]   ;;  %s486_s2 = inlined_call_operand.hbm [shape: f32[128,256], index: 2, kind: input, shape index: {}]   ;;  %s487_s3 = inlined_call_operand.hbm [shape: f32[128,256], index: 3, kind: input, shape index: {}]   ;;  %s488_s4 = inlined_call_operand.vmem [shape: f32[1,256], index: 4, kind: input, shape index: {}]   ;;  %s489_s5 = inlined_call_operand.hbm [shape: f32[8,128], index: 5, kind: output, shape index: {}]  }
   0x1   :  { %11 = vsyncpa [#allocation6], 0 }
   0x2   :  { %12 = vsyncpa [#allocation9], 0  ;;  %s30_s20 = sshll.u32 %s485_s1, 4  ;;  %s31_s20 = int_to_ptr.hbm [resolvable:$true] %s30_s20 }
   0x3   :  { %13 = vsyncpa [#allocation4], 0  ;;  %s424_s21 = smov [#allocation5]   ;;  %s19_s25 = sshll.u32 %s484_s0, 4  ;;  %s20_s25 = int_to_ptr.hbm [resolvable:$true] %s19_s25 }
   0x4   :  { %s32_s22 = sshll.u32 %s424_s21, 4  ;;  %s425_s26 = smov [#allocation2]   ;;  %s33_s22 = int_to_ptr.vmem [resolvable:$true] %s32_s22 }
   0x5   :  { %35 = dma.hbm_to_vmem [thread:$0]  %s31_s20, 128, %s33_s22, [#allocation6]  }
   0x6   :  { %s21_s27 = sshll.u32 %s425_s26, 4  ;;  %s40_s30 = sshll.u32 %s486_s2, 4  ;;  %s22_s27 = int_to_ptr.vmem [resolvable:$true] %s21_s27  ;;  %s41_s30 = int_to_ptr.hbm [resolvable:$true] %s40_s30 }
   0x7   :  { %24 = dma.hbm_to_vmem [thread:$0]  %s20_s25, 128, %s22_s27, [#allocation3]  }
   0x8   :  { %s426_s1 = smov [#allocation7]   ;;  %s53_s9 = sshll.u32 %s487_s3, 4  ;;  %s54_s9 = int_to_ptr.hbm [resolvable:$true] %s53_s9 }
   0x9   :  { %s42_s6 = sshll.u32 %s426_s1, 4  ;;  %s427_s10 = smov 256   ;;  %s43_s6 = int_to_ptr.vmem [resolvable:$true] %s42_s6 }
   0xa   :  { %s428_s0 = smov 16   ;;  %s429_s11 = smov [#allocation8]  }
   0xb   :  { %48 = dma.hbm_to_vmem [thread:$0]  %s41_s30, 4096, %s43_s6, [#allocation6], %s427_s10, %s427_s10, %s428_s0  }
   0xc   :  { %s55_s12 = sshll.u32 %s429_s11, 4  ;;  %s56_s12 = int_to_ptr.vmem [resolvable:$true] %s55_s12 }
   0xd   :  { %61 = dma.hbm_to_vmem [thread:$0]  %s54_s9, 4096, %s56_s12, [#allocation9], %s427_s10, %s427_s10, %s428_s0  }
   0xe   :  { %416 = dma.done.wait [#allocation3], 128  }
   0xf   :  { %417 = vsyncadd [#allocation3], 4294967168 }
  0x10   :  { %418 = dma.done.wait [#allocation6], 4224  }
  0x11   :  { %419 = vsyncadd [#allocation6], 4294963072 }
  0x12   :  { %420 = dma.done.wait [#allocation9], 4096  }
  0x13   :  { %421 = vsyncadd [#allocation9], 4294963200  ;;  %v113_v0 = vld [vmem:[#allocation7 + $0xf8] sm:$0xff]  ;;  %v111_v1 = vld [vmem:[#allocation7 + $0xe8] sm:$0xff]  ;;  %s268_s16 = sshll.u32 %s489_s5, 4  ;;  %s269_s16 = int_to_ptr.hbm [resolvable:$true] %s268_s16 }
  0x14   :  { %207 = vmatpush.msra.mxu3 %v113_v0  ;;  %v145_v2 = vld [vmem:[#allocation8 + $0xf8] sm:$0xff]  ;;  %v143_v3 = vld [vmem:[#allocation8 + $0xe8] sm:$0xff]  ;;  %v112_v14 = vld [vmem:[#allocation7 + $0xf0] sm:$0xff] }
  0x15   :  { %v109_v4 = vld [vmem:[#allocation7 + $0xd8] sm:$0xff]  ;;  %167 = vmatpush.msra.mxu1 %v145_v2  ;;  %v107_v6 = vld [vmem:[#allocation7 + $0xc8] sm:$0xff]  ;;  %v110_v15 = vld [vmem:[#allocation7 + $0xe0] sm:$0xff]  ;;  %187 = vmatpush.msra.mxu2 %v112_v14 }
  0x16   :  { %208 = vmatpush.msra.mxu3 %v111_v1  ;;  %v141_v5 = vld [vmem:[#allocation8 + $0xd8] sm:$0xff]  ;;  %v139_v7 = vld [vmem:[#allocation8 + $0xc8] sm:$0xff]  ;;  %v144_v17 = vld [vmem:[#allocation8 + $0xf0] sm:$0xff] }
  0x17   :  { %168 = vmatpush.msra.mxu1 %v143_v3  ;;  %v105_v8 = vld [vmem:[#allocation7 + $0xb8] sm:$0xff]  ;;  %v103_v10 = vld [vmem:[#allocation7 + $0xa8] sm:$0xff]  ;;  %v108_v19 = vld [vmem:[#allocation7 + $0xd0] sm:$0xff]  ;;  %147 = vmatpush.msra.mxu0 %v144_v17 }
  0x18   :  { %209 = vmatpush.msra.mxu3 %v109_v4  ;;  %v137_v9 = vld [vmem:[#allocation8 + $0xb8] sm:$0xff]  ;;  %v135_v11 = vld [vmem:[#allocation8 + $0xa8] sm:$0xff]  ;;  %v142_v20 = vld [vmem:[#allocation8 + $0xe0] sm:$0xff]  ;;  %188 = vmatpush.msra.mxu2 %v110_v15 }
  0x19   :  { %169 = vmatpush.msra.mxu1 %v141_v5  ;;  %v101_v12 = vld [vmem:[#allocation7 + $0x98] sm:$0xff]  ;;  %v99_v16 = vld [vmem:[#allocation7 + $0x88] sm:$0xff]  ;;  %v140_v22 = vld [vmem:[#allocation8 + $0xd0] sm:$0xff]  ;;  %148 = vmatpush.msra.mxu0 %v142_v20 }
  0x1a   :  { %210 = vmatpush.msra.mxu3 %v107_v6  ;;  %v133_v13 = vld [vmem:[#allocation8 + $0x98] sm:$0xff]  ;;  %v131_v18 = vld [vmem:[#allocation8 + $0x88] sm:$0xff]  ;;  %v106_v24 = vld [vmem:[#allocation7 + $0xc0] sm:$0xff]  ;;  %189 = vmatpush.msra.mxu2 %v108_v19 }
  0x1b   :  { %170 = vmatpush.msra.mxu1 %v139_v7  ;;  %v97_v21 = vld [vmem:[#allocation7 + $0x78] sm:$0xff]  ;;  %v95_v25 = vld [vmem:[#allocation7 + $0x68] sm:$0xff]  ;;  %v138_v26 = vld [vmem:[#allocation8 + $0xc0] sm:$0xff]  ;;  %149 = vmatpush.msra.mxu0 %v140_v22 }
  0x1c   :  { %211 = vmatpush.msra.mxu3 %v105_v8  ;;  %v129_v23 = vld [vmem:[#allocation8 + $0x78] sm:$0xff]  ;;  %v127_v27 = vld [vmem:[#allocation8 + $0x68] sm:$0xff]  ;;  %v104_v28 = vld [vmem:[#allocation7 + $0xb0] sm:$0xff]  ;;  %190 = vmatpush.msra.mxu2 %v106_v24 }
  0x1d   :  { %171 = vmatpush.msra.mxu1 %v137_v9  ;;  %v93_v29 = vld [vmem:[#allocation7 + $0x58] sm:$0xff]  ;;  %v136_v30 = vld [vmem:[#allocation8 + $0xb0] sm:$0xff]  ;;  %v102_v32 = vld [vmem:[#allocation7 + $0xa0] sm:$0xff]  ;;  %150 = vmatpush.msra.mxu0 %v138_v26 }
  0x1e   :  { %212 = vmatpush.msra.mxu3 %v103_v10  ;;  %v125_v31 = vld [vmem:[#allocation8 + $0x58] sm:$0xff]  ;;  %v91_v33 = vld [vmem:[#allocation7 + $0x48] sm:$0xff]  ;;  %191 = vmatpush.msra.mxu2 %v104_v28  ;;  %v134_v34 = vld [vmem:[#allocation8 + $0xa0] sm:$0xff] }
  0x1f   :  { %172 = vmatpush.msra.mxu1 %v135_v11  ;;  %v123_v35 = vld [vmem:[#allocation8 + $0x48] sm:$0xff]  ;;  %v100_v36 = vld [vmem:[#allocation7 + $0x90] sm:$0xff]  ;;  %151 = vmatpush.msra.mxu0 %v136_v30  ;;  %v89_v37 = vld [vmem:[#allocation7 + $0x38] sm:$0xff] }
  0x20   :  { %213 = vmatpush.msra.mxu3 %v101_v12  ;;  %192 = vmatpush.msra.mxu2 %v102_v32  ;;  %v132_v38 = vld [vmem:[#allocation8 + $0x90] sm:$0xff]  ;;  %v121_v39 = vld [vmem:[#allocation8 + $0x38] sm:$0xff]  ;;  %v98_v40 = vld [vmem:[#allocation7 + $0x80] sm:$0xff] }
  0x21   :  { %173 = vmatpush.msra.mxu1 %v133_v13  ;;  %152 = vmatpush.msra.mxu0 %v134_v34  ;;  %v87_v41 = vld [vmem:[#allocation7 + $0x28] sm:$0xff]  ;;  %v130_v42 = vld [vmem:[#allocation8 + $0x80] sm:$0xff]  ;;  %v96_v44 = vld [vmem:[#allocation7 + $0x70] sm:$0xff] }
  0x22   :  { %214 = vmatpush.msra.mxu3 %v99_v16  ;;  %193 = vmatpush.msra.mxu2 %v100_v36  ;;  %v119_v43 = vld [vmem:[#allocation8 + $0x28] sm:$0xff]  ;;  %v85_v45 = vld [vmem:[#allocation7 + $0x18] sm:$0xff]  ;;  %v128_v46 = vld [vmem:[#allocation8 + $0x70] sm:$0xff] }
  0x23   :  { %174 = vmatpush.msra.mxu1 %v131_v18  ;;  %153 = vmatpush.msra.mxu0 %v132_v38  ;;  %v117_v47 = vld [vmem:[#allocation8 + $0x18] sm:$0xff]  ;;  %v94_v48 = vld [vmem:[#allocation7 + $0x60] sm:$0xff]  ;;  %v83_v49 = vld [vmem:[#allocation7 + $0x8] sm:$0xff] }
  0x24   :  { %215 = vmatpush.msra.mxu3 %v97_v21  ;;  %194 = vmatpush.msra.mxu2 %v98_v40  ;;  %v126_v50 = vld [vmem:[#allocation8 + $0x60] sm:$0xff]  ;;  %v473_v51 = vld [vmem:[#allocation2] sm:$0xff]  ;;  %v115_v52 = vld [vmem:[#allocation8 + $0x8] sm:$0xff] }
  0x25   :  { %175 = vmatpush.msra.mxu1 %v129_v23  ;;  %154 = vmatpush.msra.mxu0 %v130_v42  ;;  %v81_v53 = vld [vmem:[#allocation5] sm:$0xff]  ;;  %v92_v54 = vld [vmem:[#allocation7 + $0x50] sm:$0xff]  ;;  %v90_v56 = vld [vmem:[#allocation7 + $0x40] sm:$0xff]  ;;  %v254_v30 = vsub.f32 0.0, %v473_v51 }
  0x26   :  { %216 = vmatpush.msra.mxu3 %v95_v25  ;;  %195 = vmatpush.msra.mxu2 %v96_v44  ;;  %v124_v55 = vld [vmem:[#allocation8 + $0x50] sm:$0xff]  ;;  %v122_v57 = vld [vmem:[#allocation8 + $0x40] sm:$0xff] }
  0x27   :  { %176 = vmatpush.msra.mxu1 %v127_v27  ;;  %155 = vmatpush.msra.mxu0 %v128_v46  ;;  %v88_v58 = vld [vmem:[#allocation7 + $0x30] sm:$0xff]  ;;  %v86_v60 = vld [vmem:[#allocation7 + $0x20] sm:$0xff] }
  0x28   :  { %217 = vmatpush.msra.mxu3 %v93_v29  ;;  %196 = vmatpush.msra.mxu2 %v94_v48  ;;  %v120_v59 = vld [vmem:[#allocation8 + $0x30] sm:$0xff]  ;;  %v118_v61 = vld [vmem:[#allocation8 + $0x20] sm:$0xff] }
  0x29   :  { %177 = vmatpush.msra.mxu1 %v125_v31  ;;  %156 = vmatpush.msra.mxu0 %v126_v50  ;;  %v84_v62 = vld [vmem:[#allocation7 + $0x10] sm:$0xff]  ;;  %v82_v0 = vld [vmem:[#allocation7] sm:$0xff] }
  0x2a   :  { %218 = vmatpush.msra.mxu3 %v91_v33  ;;  %197 = vmatpush.msra.mxu2 %v92_v54  ;;  %v116_v63 = vld [vmem:[#allocation8 + $0x10] sm:$0xff]  ;;  %v114_v1 = vld [vmem:[#allocation8] sm:$0xff] }
  0x2b   :  { %178 = vmatpush.msra.mxu1 %v123_v35  ;;  %157 = vmatpush.msra.mxu0 %v124_v55  ;;  %v146_v2 = vld [vmem:[%s488_s4] sm:$0x3]  ;;  %s430_s4 = smov [#allocation10]  }
  0x2c   :  { %219 = vmatpush.msra.mxu3 %v89_v37  ;;  %198 = vmatpush.msra.mxu2 %v90_v56  ;;  %v229_v4 = vperm.slane %v146_v2, 1  ;;  %v228_v26 = vperm.slane %v146_v2, 0  ;;  %s266_s13 = sshll.u32 %s430_s4, 4  ;;  %s267_s13 = int_to_ptr.vmem [resolvable:$true] %s266_s13 }
  0x2d   :  { %179 = vmatpush.msra.mxu1 %v121_v39  ;;  %158 = vmatpush.msra.mxu0 %v122_v57 }
  0x2e   :  { %220 = vmatpush.msra.mxu3 %v87_v41  ;;  %199 = vmatpush.msra.mxu2 %v88_v58 }
  0x2f   :  { %180 = vmatpush.msra.mxu1 %v119_v43  ;;  %159 = vmatpush.msra.mxu0 %v120_v59 }
  0x30   :  { %221 = vmatpush.msra.mxu3 %v85_v45  ;;  %200 = vmatpush.msra.mxu2 %v86_v60 }
  0x31   :  { %181 = vmatpush.msra.mxu1 %v117_v47  ;;  %160 = vmatpush.msra.mxu0 %v118_v61 }
  0x32   :  { %222 = vmatpush.msra.mxu3 %v83_v49  ;;  %201 = vmatpush.msra.mxu2 %v84_v62 }
  0x33   :  { %223 = vmatmul.f32.vlgmr.msra.gmra.mxu3 %v473_v51  ;;  %182 = vmatpush.msra.mxu1 %v115_v52 }
  0x34   :  { %183 = vmatmul.f32.vlgmr.msra.gmra.mxu1 %v81_v53  ;;  %161 = vmatpush.msra.mxu0 %v116_v63 }
  0x35   :  { %202 = vmatpush.msra.mxu2 %v82_v0 }
  0x36   :  { %203 = vmatmul.f32.vlgmr.msra.gmra.mxu2 %v473_v51  ;;  %162 = vmatpush.msra.mxu0 %v114_v1 }
  0x37   :  { %163 = vmatmul.f32.vlgmr.msra.gmra.mxu0 %v81_v53 }
  0xb1   :  { %v184_v3 = vpop.f32.mrf.mxu1 }
  0xb4   :  { %v164_v21 = vpop.f32.mrf.mxu0 }
  0xb6   :  { %v224_v5 = vpop.f32.mrf.mxu3 }
  0xb7   :  { %v225_v6 = vadd.f32 %v224_v5, %v184_v3 }
  0xb9   :  { %v233_v7 = vadd.f32 %v229_v4, %v225_v6  ;;  %v204_v22 = vpop.f32.mrf.mxu2 }
  0xba   :  { %v205_v25 = vadd.f32 %v204_v22, %v164_v21 }
  0xbb   :  { %v235_v8 = vand.u32 2147483647, %v233_v7  ;;  %v234_v19 = vmax.f32 %v233_v7, 0.0 }
  0xbc   :  { %v232_v27 = vadd.f32 %v228_v26, %v205_v25 }
  0xbd   :  { %v236_v9 = vsub.f32 0.0, %v235_v8 }
  0xbf   :  { %v237_v10 = vmul.f32 1.442695, %v236_v9 }
  0xc1   :  { %288 = vpow2.f32 %v237_v10 }
  0xc7   :  { %v289_v11 = vpop.eup %288 }
  0xc8   :  { %v239_v12 = vadd.f32 1.0, %v289_v11  ;;  %v242_v13 = vmul.f32 -0.5, %v289_v11  ;;  %v245_v15 = vand.u32 2147483647, %v289_v11 }
  0xca   :  { %290 = vlog2.f32 %v239_v12  ;;  %v243_v14 = vadd.f32 1.0, %v242_v13  ;;  %vm246_vm0 = vcmp.lt.f32.partialorder %v245_v15, 0.0004427343 }
  0xcc   :  { %v244_v18 = vmul.f32 %v289_v11, %v243_v14 }
  0xd0   :  { %v291_v16 = vpop.eup %290 }
  0xd1   :  { %v241_v17 = vmul.f32 0.6931472, %v291_v16 }
  0xd3   :  { %v247_v20 = vsel %vm246_vm0, %v244_v18, %v241_v17 }
  0xd4   :  { %v248_v23 = vadd.f32 %v247_v20, %v234_v19 }
  0xd6   :  { %v249_v24 = vadd.f32 0.01, %v248_v23 }
  0xd8   :  { %292 = vrcp.f32 %v249_v24 }
  0xd9   :  { %294 = vtanh.f32 %v232_v27 }
  0xde   :  { %v293_v28 = vpop.eup %292 }
  0xdf   :  { %v251_v29 = vmul.f32 %v293_v28, %v249_v24  ;;  %v295_v33 = vpop.eup %294 }
  0xe1   :  { %v252_v31 = vsub.f32 2.0, %v251_v29 }
  0xe3   :  { %v253_v32 = vmul.f32 %v293_v28, %v252_v31 }
  0xe5   :  { %v255_v34 = vmul.f32 %v254_v30, %v253_v32 }
  0xe7   :  { %v257_v35 = vadd.f32 %v295_v33, %v255_v34 }
  0xe9   :  { %v280_v36 = vclamps-f32 %v257_v35, 10.0 }
  0xeb   :  { %260 = vst [vmem:[#allocation10] sm:$0xff] %v280_v36 }
  0xec   :  { %271 = dma.vmem_to_hbm [thread:$0]  %s267_s13, 128, %s269_s16, [#allocation4]  }
  0xed   :  { %422 = dma.done.wait [#allocation4], 128  }
  0xee   :  { %423 = vsyncadd [#allocation4], 4294967168 }
  0xef   :  { %276 = vsyncpa [#allocation3], 1 }
  0xf0   :  { %277 = vsyncpa [#allocation6], 1 }
  0xf1   :  { %278 = vsyncpa [#allocation9], 1 }
  0xf2   :  { %279 = vsyncpa [#allocation4], 1 }

</bundles_post_ra>
